<compile_context>
chip_gen: v6e
topology: v6e:2x2x1
jax: 0.10.0
libtpu: 0.0.40
codegen_flags: <defaults>
</compile_context>

<pallas_src>
import jax
import jax.numpy as jnp
from jax import lax
from jax.experimental import pallas as pl
from jax.experimental.pallas import tpu as pltpu

_LANES = 128
_SUBLANES = 8


def _ce_partial_kernel(logits_ref, labels_ref, weight_ref, out_ref):
    # logits_ref: (TM, Cp)   float (bf16/f32 in HBM; upcast here)
    # labels_ref: (TM, 1)    int32 (padded rows carry label == Cp -> never matches)
    # weight_ref: (1, Cp)    f32   (padded classes carry weight 0)
    # out_ref:    (1, 2, 128) f32  -> [:,0,:] = num partial, [:,1,:] = den partial
    logits = logits_ref[...].astype(jnp.float32)           # (TM, Cp)
    labels = labels_ref[...]                                # (TM, 1)
    w = weight_ref[...]                                     # (1, Cp) f32

    # Numerically stable log-softmax pieces (2 cross-lane reductions per row).
    m = jnp.max(logits, axis=-1, keepdims=True)             # (TM, 1)
    shifted = logits - m                                     # (TM, Cp)
    lse = jnp.log(jnp.sum(jnp.exp(shifted), axis=-1, keepdims=True))  # (TM, 1)

    # Label gather as a select: weight at the label lane, 0 elsewhere.
    col = lax.broadcasted_iota(jnp.int32, logits.shape, 1)   # (TM, Cp)
    mask = col == labels                                      # (TM, Cp) bool
    wm = jnp.where(mask, w, 0.0)                              # (TM, Cp) f32

    # num = sum_i w[y_i] * (lse_i - (pred_i[y_i] - m_i));  den = sum_i w[y_i].
    num = jnp.sum(wm * (lse - shifted))                       # scalar
    den = jnp.sum(wm)                                         # scalar

    sel = lax.broadcasted_iota(jnp.int32, out_ref.shape, 1)   # (1, 2, 128)
    out_ref[...] = jnp.where(sel == 0, num, den)              # lane-dense store


def _round_up(x, m):
    return (x + m - 1) // m * m


def _choose_row_tile(n, c_pad, itemsize, row_tile=None):
    if row_tile is None:
        budget = 4 * 1024 * 1024  # ~4 MiB logits tile; Pallas double-buffers it
        row_tile = budget // (c_pad * max(int(itemsize), 4))
        row_tile = min(row_tile, 1024)
    row_tile = max(_SUBLANES, (int(row_tile) // _SUBLANES) * _SUBLANES)
    return min(row_tile, _round_up(n, _SUBLANES))


def ce_loss(predicted, labels, weight_ce, *, row_tile=None):
    """Weighted cross-entropy, mean reduction (matches nn.CrossEntropyLoss(weight=w))."""
    n, c = predicted.shape
    if not jnp.issubdtype(predicted.dtype, jnp.floating):
        predicted = predicted.astype(jnp.float32)

    c_pad = _round_up(c, _LANES)
    itemsize = jnp.dtype(predicted.dtype).itemsize
    tm = _choose_row_tile(n, c_pad, itemsize, row_tile)
    n_pad = _round_up(n, tm)
    num_tiles = n_pad // tm

    # Padding rules (correctness): padded class lanes get a very negative finite
    # logit (exp -> 0) and weight 0; padded rows get an out-of-range label so the
    # select mask is all-false and they contribute 0 to both num and den.
    neg_fill = float(jnp.finfo(predicted.dtype).min) / 2
    logits_p = jnp.pad(predicted, ((0, n_pad - n), (0, c_pad - c)),
                       constant_values=neg_fill)
    labels_p = jnp.pad(labels.astype(jnp.int32), (0, n_pad - n),
                       constant_values=c_pad).reshape(n_pad, 1)
    weight_p = jnp.pad(weight_ce.astype(jnp.float32), (0, c_pad - c)).reshape(1, c_pad)

    cost = pl.CostEstimate(
        flops=6 * n_pad * c_pad,
        transcendentals=n_pad * c_pad,
        bytes_accessed=int(itemsize * n_pad * c_pad + 4 * n_pad + 4 * c_pad
                           + 4 * num_tiles * 2 * _LANES),
    )

    partials = pl.pallas_call(
        _ce_partial_kernel,
        out_shape=jax.ShapeDtypeStruct((num_tiles, 2, _LANES), jnp.float32),
        grid=(num_tiles,),
        in_specs=[
            pl.BlockSpec((tm, c_pad), lambda i: (i, 0)),   # logits tile
            pl.BlockSpec((tm, 1), lambda i: (i, 0)),       # labels tile
            pl.BlockSpec((1, c_pad), lambda i: (0, 0)),    # class weights (constant)
        ],
        out_specs=pl.BlockSpec((1, 2, _LANES), lambda i: (i, 0, 0)),
        compiler_params=pltpu.CompilerParams(
            dimension_semantics=("parallel",),
            vmem_limit_bytes=48 * 1024 * 1024,
        ),
        cost_estimate=cost,
    )(logits_p, labels_p, weight_p)

    num = jnp.sum(partials[:, 0, 0])
    den = jnp.sum(partials[:, 1, 0])
    return num / den
    # TODO(synk): torch's ignore_index semantics (e.g. label == -100) are not
    # modeled; out-of-range labels silently contribute 0 to num and den.


def _ce_loss_ref(predicted, labels, weight_ce):
    # Pure-JAX reference (same math as torch.nn.CrossEntropyLoss(weight=...)).
    logp = jax.nn.log_softmax(predicted.astype(jnp.float32), axis=-1)
    nll = -jnp.take_along_axis(logp, labels[:, None].astype(jnp.int32), axis=-1)[:, 0]
    w = weight_ce.astype(jnp.float32)[labels]
    return jnp.sum(w * nll) / jnp.sum(w)


if __name__ == "__main__":
    key = jax.random.PRNGKey(0)
    k1, k2, k3 = jax.random.split(key, 3)

    # Case 1: small f32 batch, C not a multiple of 128 (exercises class padding).
    N, C = 8, 32
    predicted = jax.random.normal(k1, (N, C), dtype=jnp.float32)
    labels = jax.random.randint(k2, (N,), 0, C, dtype=jnp.int32)
    weight_CE = jax.random.uniform(k3, (C,), dtype=jnp.float32, minval=0.5, maxval=1.5)

    loss = jax.block_until_ready(ce_loss(predicted, labels, weight_CE))
    ref = _ce_loss_ref(predicted, labels, weight_CE)
    assert jnp.allclose(loss, ref, rtol=1e-5, atol=1e-5), (loss, ref)

    # Case 2: bf16 logits straight from HBM (upcast inside the kernel), ragged
    # N and C, multi-tile grid with padded rows and padded classes.
    k4, k5, k6 = jax.random.split(jax.random.PRNGKey(1), 3)
    N2, C2 = 20, 200
    pred2 = jax.random.normal(k4, (N2, C2), dtype=jnp.bfloat16)
    lab2 = jax.random.randint(k5, (N2,), 0, C2, dtype=jnp.int32)
    w2 = jax.random.uniform(k6, (C2,), dtype=jnp.float32, minval=0.5, maxval=1.5)

    loss2 = jax.block_until_ready(ce_loss(pred2, lab2, w2, row_tile=8))
    ref2 = _ce_loss_ref(pred2, lab2, w2)
    assert jnp.allclose(loss2, ref2, rtol=2e-3, atol=2e-3), (loss2, ref2)

    print("KERNEL_OK")
</pallas_src>

<mosaic_0001>
module attributes {stable_mosaic.version = 11 : i64} {
  func.func @_ce_partial_kernel(%arg0: i32, %arg1: memref<8x128xf32, #tpu.memory_space<vmem>>, %arg2: memref<8x1xi32, #tpu.memory_space<vmem>>, %arg3: memref<1x128xf32, #tpu.memory_space<vmem>>, %arg4: memref<1x2x128xf32, #tpu.memory_space<vmem>>) attributes {dimension_semantics = [#tpu.dimension_semantics<parallel>], iteration_bounds = array<i64: 1>, scalar_prefetch = 0 : i64, scratch_operands = 0 : i64, tpu.core_type = #tpu.core_type<tc>, window_params = [{transform_indices = @transform_0, window_bounds = array<i64: 8, 128>}, {transform_indices = @transform_1, window_bounds = array<i64: 8, 1>}, {pipeline_mode = #tpu.pipeline_mode<synchronous>, transform_indices = @transform_2, window_bounds = array<i64: 1, 128>}, {transform_indices = @transform_3, window_bounds = array<i64: 1, 2, 128>}]} {
    %c0 = arith.constant 0 : index
    %c0_0 = arith.constant 0 : index
    %0 = vector.load %arg1[%c0, %c0_0] : memref<8x128xf32, #tpu.memory_space<vmem>>, vector<8x128xf32>
    %c0_1 = arith.constant 0 : index
    %c0_2 = arith.constant 0 : index
    %1 = vector.load %arg2[%c0_1, %c0_2] : memref<8x1xi32, #tpu.memory_space<vmem>>, vector<8x1xi32>
    %c0_3 = arith.constant 0 : index
    %c0_4 = arith.constant 0 : index
    %2 = vector.load %arg3[%c0_3, %c0_4] : memref<1x128xf32, #tpu.memory_space<vmem>>, vector<1x128xf32>
    %cst = arith.constant dense<0xFF800000> : vector<8xf32>
    %3 = vector.multi_reduction <maximumf>, %0, %cst [1] : vector<8x128xf32> to vector<8xf32>
    %4 = vector.shape_cast %3 : vector<8xf32> to vector<8x1xf32>
    %5 = vector.broadcast %4 : vector<8x1xf32> to vector<8x128xf32>
    %6 = arith.subf %0, %5 : vector<8x128xf32>
    %7 = math.exp %6 : vector<8x128xf32>
    %cst_5 = arith.constant dense<0.000000e+00> : vector<8xf32>
    %8 = vector.multi_reduction <add>, %7, %cst_5 [1] : vector<8x128xf32> to vector<8xf32>
    %9 = vector.shape_cast %8 : vector<8xf32> to vector<8x1xf32>
    %10 = math.log %9 : vector<8x1xf32>
    %11 = tpu.iota {dimensions = array<i32: 1>} : vector<8x128xi32>
    %12 = vector.broadcast %1 : vector<8x1xi32> to vector<8x128xi32>
    %13 = arith.cmpi eq, %11, %12 : vector<8x128xi32>
    %cst_6 = arith.constant 0.000000e+00 : f32
    %14 = vector.shape_cast %2 : vector<1x128xf32> to vector<1x128xf32>
    %15 = vector.broadcast %14 : vector<1x128xf32> to vector<8x128xf32>
    %16 = vector.broadcast %cst_6 : f32 to vector<8x128xf32>
    %17 = arith.select %13, %15, %16 : vector<8x128xi1>, vector<8x128xf32>
    %18 = vector.broadcast %10 : vector<8x1xf32> to vector<8x128xf32>
    %19 = arith.subf %18, %6 : vector<8x128xf32>
    %20 = arith.mulf %17, %19 : vector<8x128xf32>
    %21 = vector.shape_cast %20 : vector<8x128xf32> to vector<1x8x128xf32>
    %cst_7 = arith.constant dense<0.000000e+00> : vector<1xf32>
    %22 = vector.multi_reduction <add>, %21, %cst_7 [1, 2] : vector<1x8x128xf32> to vector<1xf32>
    %23 = vector.shape_cast %22 : vector<1xf32> to vector<1x1x1xf32>
    %24 = vector.extract %23[0, 0, 0] : f32 from vector<1x1x1xf32>
    %25 = vector.shape_cast %17 : vector<8x128xf32> to vector<1x8x128xf32>
    %cst_8 = arith.constant dense<0.000000e+00> : vector<1xf32>
    %26 = vector.multi_reduction <add>, %25, %cst_8 [1, 2] : vector<1x8x128xf32> to vector<1xf32>
    %27 = vector.shape_cast %26 : vector<1xf32> to vector<1x1x1xf32>
    %28 = vector.extract %27[0, 0, 0] : f32 from vector<1x1x1xf32>
    %29 = tpu.iota {dimensions = array<i32: 1>} : vector<1x2x128xi32>
    %c0_i32 = arith.constant 0 : i32
    %30 = vector.broadcast %c0_i32 : i32 to vector<1x2x128xi32>
    %31 = arith.cmpi eq, %29, %30 : vector<1x2x128xi32>
    %32 = vector.broadcast %24 : f32 to vector<1x2x128xf32>
    %33 = vector.broadcast %28 : f32 to vector<1x2x128xf32>
    %34 = arith.select %31, %32, %33 : vector<1x2x128xi1>, vector<1x2x128xf32>
    %c0_9 = arith.constant 0 : index
    %c0_10 = arith.constant 0 : index
    %c0_11 = arith.constant 0 : index
    %35 = vector.load %arg4[%c0_9, %c0_10, %c0_11] : memref<1x2x128xf32, #tpu.memory_space<vmem>>, vector<1x2x128xf32>
    tpu.vector_store %arg4[%c0_9, %c0_10, %c0_11], %34 {strides = array<i32>} : memref<1x2x128xf32, #tpu.memory_space<vmem>>, vector<1x2x128xf32>,
    return
  }
  func.func @transform_0(%arg0: i32) -> (i32, i32) {
    %c0_i32 = arith.constant 0 : i32
    %c0_i32_0 = arith.constant 0 : i32
    return %arg0, %c0_i32 : i32, i32
  }
  func.func @transform_1(%arg0: i32) -> (i32, i32) {
    %c0_i32 = arith.constant 0 : i32
    %c0_i32_0 = arith.constant 0 : i32
    return %arg0, %c0_i32 : i32, i32
  }
  func.func @transform_2(%arg0: i32) -> (i32, i32) {
    %c0_i32 = arith.constant 0 : i32
    %c0_i32_0 = arith.constant 0 : i32
    %c0_i32_1 = arith.constant 0 : i32
    return %c0_i32, %c0_i32_0 : i32, i32
  }
  func.func @transform_3(%arg0: i32) -> (i32, i32, i32) {
    %c0_i32 = arith.constant 0 : i32
    %c0_i32_0 = arith.constant 0 : i32
    %c0_i32_1 = arith.constant 0 : i32
    return %arg0, %c0_i32, %c0_i32_0 : i32, i32, i32
  }
}

</mosaic_0001>

<bundles_post_ra>
// kernel: tpu_custom_call.1
= control target key start
LH: loop header
LB: loop body
LE: loop exit
PB: predicated region body
PF: predicated region fallthrough
CT: control target
= control target key end

     0   :  { %s150_s0 = inlined_call_operand.vmem [shape: f32[8,128], index: 0, kind: input, shape index: {}]   ;;  %s151_s1 = inlined_call_operand.vmem [shape: s32[8,1], index: 1, kind: input, shape index: {}]   ;;  %s152_s2 = inlined_call_operand.vmem [shape: f32[1,128], index: 2, kind: input, shape index: {}]   ;;  %s153_s3 = inlined_call_operand.hbm [shape: f32[1,2,128], index: 3, kind: output, shape index: {}]  }
   0x1   :  { %v15_v0 = vld [vmem:[%s150_s0] sm:$0xff] }
   0x2   :  { %8 = vsyncpa [#allocation3], 0  ;;  %18 = vmax.xlane.f32.xlu0 %v15_v0  ;;  %v16_v1 = vld [vmem:[%s151_s1] sm:$0xff]  ;;  %v116_v2 = vmov 0   ;;  %v27_v7 = vlaneseq  ;;  %s117_s1 = smov [#allocation2]  }
   0x3   :  { %88 = vset.pattern.permute.xlu1 %v116_v2  ;;  %89 = vset.pattern.permute.xlu0 %v116_v2  ;;  %v81_v10 = vld [vmem:[%s152_s2] ss:$0 sm:$0xff]  ;;  %s73_s2 = sshll.u32 %s117_s1, 4  ;;  %s74_s2 = int_to_ptr.vmem [resolvable:$true] %s73_s2 }
   0x4   :  { %30 = vperm.xlu1 %88, %v16_v1   ;;  %v28_v8 = vand.u32 127, %v27_v7  ;;  %v61_v31 = vshrl.u32 %v27_v7, 7  ;;  %s94_s19 = scalar_lea.vmem %s74_s2, 32  ;;  %p99_p1 = scmp.lt.s32.totalorder %s74_s2, %s74_s2 }
   0x5   :  { %p95_p0 = scmp.ne.s32.totalorder %s74_s2, %s94_s19  ;;  %p100_p2 = scmp.lt.s32.totalorder %s94_s19, %s94_s19 }
   0x6   :  { %vm62_vm1 = vcmp.eq.s32.totalorder %v61_v31, 0 }
   0x7   :  { %p101_p3 = por %p100_p2, %p99_p1 }
   0x9   :  { %p102_p4 = pnand %p101_p3, %p95_p0 }
  0x7f   :  { %v31_v9 = vpop.permute.xlu1 %30 }
  0x80   :  { %vm32_vm0 = vcmp.eq.s32.totalorder %v28_v8, %v31_v9 }
  0x81   :  { %v39_v11 = vsel %vm32_vm0, %v81_v10, 0.0 }
  0x8b   :  { %v19_v3 = vpop.xlane.xlu0 %18 }
  0x8c   :  { %v20_v4 = vsub.f32 %v15_v0, %v19_v3 }
  0x8e   :  { %v21_v5 = vmul.f32 1.442695, %v20_v4 }
  0x90   :  { %90 = vpow2.f32 %v21_v5 }
  0x9d   :  { %v91_v6 = vpop.eup %90 }
  0x9e   :  { %23 = vadd.xlane.f32.xlu0 %v91_v6 }
  0xa2   :  { %51 = vadd.xlane.f32.xlu0 %v39_v11 }
 0x127   :  { %v24_v12 = vpop.xlane.xlu0 %23 }
 0x128   :  { %92 = vlog2.f32 %v24_v12 }
 0x12b   :  { %v52_v17 = vpop.xlane.xlu0 %51 }
 0x12c   :  { %v53_v18 = vrot.slane %v52_v17, 4 }
 0x12e   :  { %v54_v19 = vadd.f32 %v53_v18, %v52_v17 }
 0x130   :  { %v55_v20 = vrot.slane %v54_v19, 2 }
 0x132   :  { %v56_v24 = vadd.f32 %v55_v20, %v54_v19 }
 0x134   :  { %v57_v27 = vrot.slane %v56_v24, 1 }
 0x135   :  { %v93_v13 = vpop.eup %92 }
 0x136   :  { %v26_v14 = vmul.f32 0.6931472, %v93_v13  ;;  %v58_v30 = vadd.f32 %v57_v27, %v56_v24 }
 0x138   :  { %v40_v15 = vsub.f32 %v26_v14, %v20_v4 }
 0x13a   :  { %v41_v16 = vmul.f32 %v40_v15, %v39_v11 }
 0x13c   :  { %42 = vadd.xlane.f32.xlu1 %v41_v16 }
 0x1c5   :  { %v43_v21 = vpop.xlane.xlu1 %42 }
 0x1c6   :  { %v44_v22 = vrot.slane %v43_v21, 4 }
 0x1c8   :  { %v45_v23 = vadd.f32 %v44_v22, %v43_v21 }
 0x1ca   :  { %v46_v25 = vrot.slane %v45_v23, 2 }
 0x1cc   :  { %v47_v26 = vadd.f32 %v46_v25, %v45_v23 }
 0x1ce   :  { %v48_v28 = vrot.slane %v47_v26, 1 }
 0x1d0   :  { %v49_v29 = vadd.f32 %v48_v28, %v47_v26 }
 0x1d2   :  { %82 = vpush %v49_v29 }
 0x1d3   :  { %84 = vpush %v58_v30 }
 0x203   :  { %s83_s17 = spop %82 }
 0x204   :  { %v63_v32 = vstv %s83_s17  ;;  %s85_s18 = spop %84 }
 0x205   :  { %v64_v33 = vstv %s85_s18 }
 0x206   :  { %v65_v34 = vsel %vm62_vm1, %v63_v32, %v64_v33 }
 0x207   :  { %66 = vst [vmem:[#allocation2] sm:$0x3] %v65_v34 }
 0x208   :  { %105 = shalt.err (!%p102_p4)
}
 0x209   :  { %76 = dma.vmem_to_hbm [thread:$0]  %s74_s2, 32, %s153_s3, [#allocation3]  }
 0x20a   :  { %114 = dma.done.wait [#allocation3], 32  }
 0x20b   :  { %115 = vsyncadd [#allocation3], 4294967264 }
 0x20c   :  { %80 = vsyncpa [#allocation3], 1 }

</bundles_post_ra>
